<compile_context>
chip_gen: v7x
topology: tpu7x:2x2x1
jax: 0.10.0
libtpu: 0.0.40
codegen_flags: <defaults>
</compile_context>

<pallas_src>
import jax
import jax.numpy as jnp
from jax import lax
from jax.experimental import pallas as pl
from jax.experimental.pallas import tpu as pltpu


def _round_up(x, m):
    return (x + m - 1) // m * m


def _cdiv(a, b):
    return (a + b - 1) // b


def critic_kernel(x_ref, w1_ref, b1_ref, w2_ref, b2_ref, out_ref):
    # x_ref : (TB, D)  state tile, straight from HBM (no wrapper transpose)
    # w1_ref: (H, D)   fc weight (PyTorch layout), VMEM-resident
    # b1_ref: (H, 1)   fc bias as a column
    # w2_ref: (1, H)   value_layer weight row
    # b2_ref: (1, 1)   value_layer bias (SMEM scalar)
    # out_ref:(1, TB)  value row (lane-dense store)

    # fc: h = W1 @ x^T, contracting over D on the MXU with f32 accumulation.
    h = lax.dot_general(
        w1_ref[...], x_ref[...],
        dimension_numbers=(((1,), (1,)), ((), ())),
        preferred_element_type=jnp.float32,
    )
    h = jnp.maximum(h + b1_ref[...], 0.0)

    # value_layer on the heavily under-utilized MXU: (1, H) @ (H, TB) -> (1, TB).
    v = jnp.dot(w2_ref[...], h, preferred_element_type=jnp.float32) + b2_ref[0, 0]

    out_ref[...] = v.astype(out_ref.dtype)


def critic_forward(state, w1, b1, w2, b2, *, tb_max=8192, target_steps=8,
                   small_batch_threshold=1024):
    """Critic forward pass.

    state: (B, input_dim) float32
    w1: (hidden, input_dim), b1: (hidden,), w2: (1, hidden), b2: (1,)
      -- PyTorch nn.Linear layouts.
    Returns (B, 1) float32.
    """
    B, D = state.shape
    H = w1.shape[0]

    x = state.astype(jnp.float32)
    w1_f = w1.astype(jnp.float32)
    b1_f = b1.astype(jnp.float32)
    w2_f = w2.astype(jnp.float32)
    b2_f = b2.astype(jnp.float32)

    # Small batches (the actual RL-loop regime): a single fused XLA dot beats
    # any pallas_call fixed cost (pad + launch + grid step).
    if B < small_batch_threshold:
        h = jnp.maximum(x @ w1_f.T + b1_f, 0.0)
        return h @ w2_f.T + b2_f

    # Batch tile: target ~`target_steps` grid steps (>= 2 so the "parallel"
    # batch axis shards across both v7x TensorCores), multiple of 128 lanes,
    # capped so the double-buffered lane-padded (tb, D) tile (~1 KiB/row)
    # stays inside the default scoped VMEM on all generations.
    tb = max(128, min(_round_up(tb_max, 128),
                      _round_up(_cdiv(B, target_steps), 128)))
    B_pad = _round_up(B, tb)
    if B_pad != B:
        # Zero rows produce finite values (relu(b1)@w2 + b2) that are sliced off.
        x = jnp.pad(x, ((0, B_pad - B), (0, 0)))

    b1_col = b1_f.reshape(H, 1)
    w2_row = w2_f.reshape(1, H)
    b2_s = b2_f.reshape(1, 1)

    out = pl.pallas_call(
        critic_kernel,
        out_shape=jax.ShapeDtypeStruct((1, B_pad), jnp.float32),
        grid=(B_pad // tb,),
        in_specs=[
            pl.BlockSpec((tb, D), lambda i: (i, 0)),   # state tile (no transpose pass)
            pl.BlockSpec((H, D), lambda i: (0, 0)),    # w1, stays VMEM-resident
            pl.BlockSpec((H, 1), lambda i: (0, 0)),    # b1 column
            pl.BlockSpec((1, H), lambda i: (0, 0)),    # w2 row
            pl.BlockSpec(memory_space=pltpu.SMEM),     # b2 scalar
        ],
        out_specs=pl.BlockSpec((1, tb), lambda i: (0, i)),
        compiler_params=pltpu.CompilerParams(
            dimension_semantics=("parallel",),
        ),
    )(x, w1_f, b1_col, w2_row, b2_s)

    return out[0, :B].reshape(B, 1)


def init_params(key, input_dim=8, hidden_dim=128):
    """Deterministic init mimicking PyTorch Linear default (U[-1/sqrt(fan_in), +]).
    Weights returned in PyTorch layout: w1 (H, D), b1 (H,), w2 (1, H), b2 (1,)."""
    k1, k2, k3, k4 = jax.random.split(key, 4)
    bound1 = 1.0 / jnp.sqrt(input_dim)
    bound2 = 1.0 / jnp.sqrt(hidden_dim)
    w1 = jax.random.uniform(k1, (hidden_dim, input_dim), jnp.float32, -bound1, bound1)
    b1 = jax.random.uniform(k2, (hidden_dim,), jnp.float32, -bound1, bound1)
    w2 = jax.random.uniform(k3, (1, hidden_dim), jnp.float32, -bound2, bound2)
    b2 = jax.random.uniform(k4, (1,), jnp.float32, -bound2, bound2)
    return w1, b1, w2, b2


if __name__ == "__main__":
    key = jax.random.PRNGKey(0)
    k_small, k_mid, k_big, k_params = jax.random.split(key, 4)

    input_dim, hidden_dim = 8, 128
    w1, b1, w2, b2 = init_params(k_params, input_dim, hidden_dim)

    def reference(s):
        return jnp.maximum(s @ w1.T + b1, 0.0) @ w2.T + b2

    # Tiny batch (what the RL loop actually uses) -> fused XLA dispatch path.
    s_small = jax.random.normal(k_small, (2, input_dim), jnp.float32)
    out_small = jax.block_until_ready(critic_forward(s_small, w1, b1, w2, b2))
    assert out_small.shape == (2, 1)
    assert jnp.allclose(out_small, reference(s_small), atol=1e-4)

    # Non-tile-aligned batch, forced through the Pallas path: exercises the
    # multi-step grid, tail padding and lane-dense output store.
    s_mid = jax.random.normal(k_mid, (300, input_dim), jnp.float32)
    out_mid = jax.block_until_ready(
        critic_forward(s_mid, w1, b1, w2, b2, small_batch_threshold=0))
    assert out_mid.shape == (300, 1)
    assert jnp.allclose(out_mid, reference(s_mid), atol=1e-4)

    # Large batch -> Pallas path with an 8-step "parallel" grid.
    s_big = jax.random.normal(k_big, (4096, input_dim), jnp.float32)
    out_big = jax.block_until_ready(critic_forward(s_big, w1, b1, w2, b2))
    assert out_big.shape == (4096, 1)
    assert jnp.allclose(out_big, reference(s_big), atol=1e-4)

    print("KERNEL_OK")
</pallas_src>

<mosaic_0001>
module attributes {stable_mosaic.version = 11 : i64} {
  func.func @critic_kernel(%arg0: i32, %arg1: memref<128x8xf32, #tpu.memory_space<vmem>>, %arg2: memref<128x8xf32, #tpu.memory_space<vmem>>, %arg3: memref<128x1xf32, #tpu.memory_space<vmem>>, %arg4: memref<1x128xf32, #tpu.memory_space<vmem>>, %arg5: memref<1x1xf32, #tpu.memory_space<smem>>, %arg6: memref<1x128xf32, #tpu.memory_space<vmem>>) attributes {dimension_semantics = [#tpu.dimension_semantics<parallel>], iteration_bounds = array<i64: 3>, scalar_prefetch = 0 : i64, scratch_operands = 0 : i64, tpu.core_type = #tpu.core_type<tc>, window_params = [{transform_indices = @transform_0, window_bounds = array<i64: 128, 8>}, {pipeline_mode = #tpu.pipeline_mode<synchronous>, transform_indices = @transform_1, window_bounds = array<i64: 128, 8>}, {pipeline_mode = #tpu.pipeline_mode<synchronous>, transform_indices = @transform_2, window_bounds = array<i64: 128, 1>}, {pipeline_mode = #tpu.pipeline_mode<synchronous>, transform_indices = @transform_3, window_bounds = array<i64: 1, 128>}, {transform_indices = @transform_4, window_bounds = array<i64: 1, 1>}, {transform_indices = @transform_5, window_bounds = array<i64: 1, 128>}]} {
    %c0 = arith.constant 0 : index
    %c0_0 = arith.constant 0 : index
    %0 = vector.load %arg2[%c0, %c0_0] : memref<128x8xf32, #tpu.memory_space<vmem>>, vector<128x8xf32>
    %c0_1 = arith.constant 0 : index
    %c0_2 = arith.constant 0 : index
    %1 = vector.load %arg1[%c0_1, %c0_2] : memref<128x8xf32, #tpu.memory_space<vmem>>, vector<128x8xf32>
    %cst = arith.constant dense<0.000000e+00> : vector<128x128xf32>
    %2 = tpu.matmul %0, %1, %cst {dimension_numbers = #tpu.dot_dimension_numbers<[1], [1], [0], [0], [0, 0, 1, 0], [], []>} : vector<128x8xf32>, vector<128x8xf32>, vector<128x128xf32> -> vector<128x128xf32>
    %c0_3 = arith.constant 0 : index
    %c0_4 = arith.constant 0 : index
    %3 = vector.load %arg3[%c0_3, %c0_4] : memref<128x1xf32, #tpu.memory_space<vmem>>, vector<128x1xf32>
    %4 = vector.broadcast %3 : vector<128x1xf32> to vector<128x128xf32>
    %5 = arith.addf %2, %4 : vector<128x128xf32>
    %cst_5 = arith.constant 0.000000e+00 : f32
    %6 = vector.broadcast %cst_5 : f32 to vector<128x128xf32>
    %7 = arith.maximumf %5, %6 : vector<128x128xf32>
    %c0_6 = arith.constant 0 : index
    %c0_7 = arith.constant 0 : index
    %8 = vector.load %arg4[%c0_6, %c0_7] : memref<1x128xf32, #tpu.memory_space<vmem>>, vector<1x128xf32>
    %cst_8 = arith.constant dense<0.000000e+00> : vector<1x128xf32>
    %9 = tpu.matmul %8, %7, %cst_8 {dimension_numbers = #tpu.dot_dimension_numbers<[1], [0], [0], [1], [0, 0, 1, 1], [], []>} : vector<1x128xf32>, vector<128x128xf32>, vector<1x128xf32> -> vector<1x128xf32>
    %c0_9 = arith.constant 0 : index
    %c0_10 = arith.constant 0 : index
    %10 = memref.load %arg5[%c0_9, %c0_10] : memref<1x1xf32, #tpu.memory_space<smem>>
    %11 = vector.broadcast %10 : f32 to vector<1x128xf32>
    %12 = arith.addf %9, %11 : vector<1x128xf32>
    %c0_11 = arith.constant 0 : index
    %c0_12 = arith.constant 0 : index
    %13 = vector.load %arg6[%c0_11, %c0_12] : memref<1x128xf32, #tpu.memory_space<vmem>>, vector<1x128xf32>
    tpu.vector_store %arg6[%c0_11, %c0_12], %12 {strides = array<i32>} : memref<1x128xf32, #tpu.memory_space<vmem>>, vector<1x128xf32>,
    return
  }
  func.func @transform_0(%arg0: i32) -> (i32, i32) {
    %c0_i32 = arith.constant 0 : i32
    %c0_i32_0 = arith.constant 0 : i32
    return %arg0, %c0_i32 : i32, i32
  }
  func.func @transform_1(%arg0: i32) -> (i32, i32) {
    %c0_i32 = arith.constant 0 : i32
    %c0_i32_0 = arith.constant 0 : i32
    %c0_i32_1 = arith.constant 0 : i32
    return %c0_i32, %c0_i32_0 : i32, i32
  }
  func.func @transform_2(%arg0: i32) -> (i32, i32) {
    %c0_i32 = arith.constant 0 : i32
    %c0_i32_0 = arith.constant 0 : i32
    %c0_i32_1 = arith.constant 0 : i32
    return %c0_i32, %c0_i32_0 : i32, i32
  }
  func.func @transform_3(%arg0: i32) -> (i32, i32) {
    %c0_i32 = arith.constant 0 : i32
    %c0_i32_0 = arith.constant 0 : i32
    %c0_i32_1 = arith.constant 0 : i32
    return %c0_i32, %c0_i32_0 : i32, i32
  }
  func.func @transform_4(%arg0: i32) -> (i32, i32) {
    %c0_i32 = arith.constant 0 : i32
    %c0_i32_0 = arith.constant 0 : i32
    %c0_i32_1 = arith.constant 0 : i32
    return %c0_i32, %c0_i32_0 : i32, i32
  }
  func.func @transform_5(%arg0: i32) -> (i32, i32) {
    %c0_i32 = arith.constant 0 : i32
    %c0_i32_0 = arith.constant 0 : i32
    return %c0_i32, %arg0 : i32, i32
  }
}

</mosaic_0001>

<bundles_post_ra>
// kernel: tpu_custom_call.1
= control target key start
LH: loop header
LB: loop body
LE: loop exit
PB: predicated region body
PF: predicated region fallthrough
CT: control target
= control target key end

     0   :  { %s1431_s0 = inlined_call_operand.vmem [shape: f32[384,8], index: 0, kind: input, shape index: {}]   ;;  %s1432_s1 = inlined_call_operand.vmem [shape: f32[128,8], index: 1, kind: input, shape index: {}]   ;;  %s1433_s2 = inlined_call_operand.vmem [shape: f32[128,1], index: 2, kind: input, shape index: {}]   ;;  %s1434_s3 = inlined_call_operand.vmem [shape: f32[1,128], index: 3, kind: input, shape index: {}]   ;;  %s1435_s4 = inlined_call_operand.<no memory space> [shape: f32[1,1], index: 4, kind: input, shape index: {}]   ;;  %s1436_s5 = inlined_call_operand.hbm [shape: f32[1,384], index: 5, kind: output, shape index: {}]  }
   0x1   :  { %10 = sst [smem:[#allocation2]] %s1435_s4 }
   0x2   :  { %11 = vsyncpa [#allocation4], 0 }
   0x3   :  { %13 = vsyncpa [#allocation4 + $0x1], 0  ;;  %s1153_s20 = smov 0   ;;  %s1155_s21 = smov 0  }
   0x4   :  { %s1157_s22 = smov 0   ;;  %s1159_s23 = smov 0  }
   0x5 LB: > { %s752_s4 = sadd.s32 4294967295, %s1113_s23   ;;  %s753_s24 = sadd.s32 4294967294, %s1113_s23   ;;  %s1113_s23 = sphi %s1159_s23, %s1444_s23   ;;  %s1109_s22 = sphi %s1157_s22, %s1443_s22   ;;  %s1105_s21 = sphi %s1155_s21, %s1442_s21   ;;  %s1101_s20 = sphi %s1153_s20, %s1441_s20  }
   0x6   : > { %s1176_s25 = sadd.s32 1, %s1113_s23   ;;  %s136_s26 = sadd.s32 1, %s1109_s22 }
   0x7   : > { %s133_s27 = ssub.s32 %s1113_s23, %s1176_s25  ;;  %p146_p0 = scmp.ne.s32.totalorder %s1109_s22, %s1105_s21 }
   0x8   : > { %p134_p1 = scmp.eq.s32.totalorder %s133_s27, 0  ;;  %p147_p2 = scmp.eq.s32.totalorder %s752_s4, 2 }
   0x9   : > { %p152_p3 = scmp.ne.s32.totalorder %s1105_s21, %s1101_s20  ;;  %p153_p4 = scmp.eq.s32.totalorder %s753_s24, 2 }
   0xa   : > { %s1186_s28 = scalar_select %p134_p1, %s1109_s22, %s136_s26  }
   0xb   : > { %p1188_p5 = por %p147_p2, %p146_p0  ;;  %p1192_p6 = por %p153_p4, %p152_p3 }
   0xc   : > { %p756_p7 = scmp.ge.s32.totalorder %s1113_s23, 1  ;;  %p192_p8 = scmp.lt.s32.totalorder %s1113_s23, 4 }
   0xe   : > { %p193_p9 = pnand %p756_p7, %p192_p8 }
   0xf   : > { %s1198_s6 = sshll.u32 (!%p193_p9), %s752_s4, 4  ;;  %vm353_vm0 = vcmask (!%p193_p9), 64512   ;;  %v225_v0 = vld [vmem:[%s1432_s1] sm:$0xff] (!%p193_p9)  ;;  %v1115_v1 = vmov (!%p193_p9), 0   ;;  %v259_v4 = vld [vmem:[%s1433_s2 + $0x10] sm:$0xff] (!%p193_p9)  ;;  %v258_v5 = vld [vmem:[%s1433_s2 + $0x8] sm:$0xff] (!%p193_p9) }
  0x10   : > { %196 = sbr.rel (%p193_p9) target bundleno = 572 (0x23c), region = 40  ;;  %p220_p10 = scmp.lt.s32.totalorder (!%p193_p9), %s1198_s6, 47  ;;  %875 = vmatprep.mubr.msk.f32.mxu0 (!%p193_p9), %vm353_vm0, %v225_v0  ;;  %1049 = vset.pattern.permute.xlu0 (!%p193_p9), %v1115_v1  ;;  %v257_v2 = vld [vmem:[%s1433_s2] sm:$0xff] (!%p193_p9)  ;;  %vm1216_vm1 = vmpackc.low (!%p193_p9), %vm353_vm0, %vm353_vm0  ;;  %v260_v11 = vld [vmem:[%s1433_s2 + $0x18] sm:$0xff] (!%p193_p9)  ;;  %v1116_v58 = vmov (!%p193_p9), 0.0|0.0   ;;  %vm1117_vm2 = vmmov (!%p193_p9), 0  }
  0x11   : > { %1050 = vset.pattern.permute.xlu1 (!%p193_p9), %v1115_v1  ;;  %275 = vperm.xlu0 (!%p193_p9), %1049, %v257_v2   ;;  %v261_v13 = vld [vmem:[%s1433_s2 + $0x20] sm:$0xff] (!%p193_p9)  ;;  %v262_v14 = vld [vmem:[%s1433_s2 + $0x28] sm:$0xff] (!%p193_p9)  ;;  %v263_v17 = vld [vmem:[%s1433_s2 + $0x30] sm:$0xff] (!%p193_p9)  ;;  %v1118_v59 = vmov (!%p193_p9), 0.0   ;;  %s612_s11 = sld [smem:[#allocation2]] (!%p193_p9)  ;;  %s217_s12 = sand.u32 (!%p193_p9), 1, %s1105_s21  }
  0x12   : > { %285 = vperm.xlu1 (!%p193_p9), %1050, %v259_v4   ;;  %v264_v19 = vld [vmem:[%s1433_s2 + $0x38] sm:$0xff] (!%p193_p9)  ;;  %v265_v20 = vld [vmem:[%s1433_s2 + $0x40] sm:$0xff] (!%p193_p9)  ;;  %v266_v21 = vld [vmem:[%s1433_s2 + $0x48] sm:$0xff] (!%p193_p9)  ;;  %982 = vmatprep.subr.bf16.mxu1 (!%p193_p9), %v1116_v58  ;;  %s218_s13 = scalar_lea.vmem (!%p193_p9), [#allocation3], %s217_s12  ;;  %s686_s18 = scalar_lea.sflag (!%p193_p9), [#allocation4], %s217_s12 }
  0x13   : > { %v267_v24 = vld [vmem:[%s1433_s2 + $0x50] sm:$0xff] (!%p193_p9)  ;;  %v268_v26 = vld [vmem:[%s1433_s2 + $0x58] sm:$0xff] (!%p193_p9)  ;;  %v269_v27 = vld [vmem:[%s1433_s2 + $0x60] sm:$0xff] (!%p193_p9)  ;;  %931 = vmatprep.mubr.msk.f32.mxu1 (!%p193_p9), %vm1117_vm2, %v1118_v59  ;;  %s698_s14 = sshll.u32 (!%p193_p9), %s218_s13, 4  ;;  %s1119_s4 = smov (!%p193_p9), [#allocation3]   ;;  %s1391_s14 = int_to_ptr.vmem [resolvable:$true] %s698_s14 }
  0x14   : > { %v270_v28 = vld [vmem:[%s1433_s2 + $0x68] sm:$0xff] (!%p193_p9)  ;;  %v271_v31 = vld [vmem:[%s1433_s2 + $0x70] sm:$0xff] (!%p193_p9)  ;;  %v272_v33 = vld [vmem:[%s1433_s2 + $0x78] sm:$0xff] (!%p193_p9)  ;;  %s1051_s19 = scalar_lea.vmem (!%p193_p9), %s1391_s14, 16  ;;  %s1055_s24 = sshll.u32 (!%p193_p9), %s1119_s4, 4  ;;  %s1056_s24 = int_to_ptr.vmem [resolvable:$false] %s1055_s24 }
  0x15   : > { %280 = vperm.xlu0 (!%p193_p9), %1049, %v258_v5   ;;  %v226_v43 = vld [vmem:[%s1432_s1 + $0x8] sm:$0xff] (!%p193_p9)  ;;  %v227_v44 = vld [vmem:[%s1432_s1 + $0x10] sm:$0xff] (!%p193_p9)  ;;  %v228_v45 = vld [vmem:[%s1432_s1 + $0x18] sm:$0xff] (!%p193_p9)  ;;  %p1052_p11 = scmp.ne.s32.totalorder (!%p193_p9), %s1391_s14, %s1051_s19  ;;  %s1057_s26 = scalar_lea.vmem (!%p193_p9), %s1056_s24, 32 }
  0x16   : > { %290 = vperm.xlu1 (!%p193_p9), %1050, %v260_v11   ;;  %v229_v46 = vld [vmem:[%s1432_s1 + $0x20] sm:$0xff] (!%p193_p9)  ;;  %v230_v47 = vld [vmem:[%s1432_s1 + $0x28] sm:$0xff] (!%p193_p9)  ;;  %v231_v48 = vld [vmem:[%s1432_s1 + $0x30] sm:$0xff] (!%p193_p9)  ;;  %p1058_p0 = scmp.lt.s32.totalorder (!%p193_p9), %s1391_s14, %s1056_s24  ;;  %p1059_p1 = scmp.lt.s32.totalorder (!%p193_p9), %s1057_s26, %s1051_s19 }
  0x17   : > { %s221_s9 = scalar_select %p220_p10, %s1198_s6, 47  ;;  %v232_v49 = vld [vmem:[%s1432_s1 + $0x38] sm:$0xff]  ;;  %v233_v50 = vld [vmem:[%s1432_s1 + $0x40] sm:$0xff]  ;;  %v234_v51 = vld [vmem:[%s1432_s1 + $0x48] sm:$0xff] }
  0x18   : > { %v235_v52 = vld [vmem:[%s1432_s1 + $0x50] sm:$0xff]  ;;  %v236_v53 = vld [vmem:[%s1432_s1 + $0x58] sm:$0xff]  ;;  %v237_v54 = vld [vmem:[%s1432_s1 + $0x60] sm:$0xff]  ;;  %p1053_p12 = pnand %p1052_p11, %p1188_p5  ;;  %p1060_p2 = por %p1059_p1, %p1058_p0 }
  0x19   : > { %s758_s10 = sshll.u32 %s221_s9, 3  ;;  %295 = vperm.xlu0 %1049, %v261_v13   ;;  %v238_v55 = vld [vmem:[%s1432_s1 + $0x68] sm:$0xff]  ;;  %v239_v56 = vld [vmem:[%s1432_s1 + $0x70] sm:$0xff]  ;;  %v240_v57 = vld [vmem:[%s1432_s1 + $0x78] sm:$0xff] }
  0x1a   : > { %s1212_s15 = scalar_lea.vmem %s1431_s0, %s758_s10  ;;  %300 = vperm.xlu1 %1050, %v262_v14   ;;  %p1054_p13 = pneg %p1053_p12 }
  0x1b   : > { %v241_v6 = vld [vmem:[%s1212_s15] sm:$0xff]  ;;  %v242_v7 = vld [vmem:[%s1212_s15 + $0x8] sm:$0xff]  ;;  %v243_v8 = vld [vmem:[%s1212_s15 + $0x10] sm:$0xff] }
  0x1c   : > { %v934_v9 = vpack.c.bf16 %v242_v7, %v241_v6  ;;  %v244_v10 = vld [vmem:[%s1212_s15 + $0x18] sm:$0xff]  ;;  %v245_v15 = vld [vmem:[%s1212_s15 + $0x20] sm:$0xff]  ;;  %v246_v16 = vld [vmem:[%s1212_s15 + $0x28] sm:$0xff]  ;;  %p1061_p3 = pnand %p1060_p2, %p1054_p13 }
  0x1d   : > { %v940_v12 = vpack.c.bf16 %v244_v10, %v243_v8  ;;  %v946_v18 = vpack.c.bf16 %v246_v16, %v245_v15  ;;  %305 = vperm.xlu0 %1049, %v263_v17   ;;  %v247_v22 = vld [vmem:[%s1212_s15 + $0x30] sm:$0xff]  ;;  %v248_v23 = vld [vmem:[%s1212_s15 + $0x38] sm:$0xff]  ;;  %v249_v29 = vld [vmem:[%s1212_s15 + $0x40] sm:$0xff] }
  0x1e   : > { %936 = vmatprep.subr.msk.bf16.mxu0 %vm1216_vm1, %v934_v9  ;;  %310 = vperm.xlu1 %1050, %v264_v19   ;;  %v952_v25 = vpack.c.bf16 %v248_v23, %v247_v22  ;;  %v250_v30 = vld [vmem:[%s1212_s15 + $0x48] sm:$0xff]  ;;  %v251_v34 = vld [vmem:[%s1212_s15 + $0x50] sm:$0xff]  ;;  %v252_v35 = vld [vmem:[%s1212_s15 + $0x58] sm:$0xff] }
  0x1f   : > { %939 = vmatpush3.bf16.xpose.msk.msra.mxu0 %vm1216_vm1, %v934_v9  ;;  %v958_v32 = vpack.c.bf16 %v250_v30, %v249_v29  ;;  %v964_v36 = vpack.c.bf16 %v252_v35, %v251_v34  ;;  %v253_v37 = vld [vmem:[%s1212_s15 + $0x60] sm:$0xff]  ;;  %v254_v38 = vld [vmem:[%s1212_s15 + $0x68] sm:$0xff]  ;;  %v255_v40 = vld [vmem:[%s1212_s15 + $0x70] sm:$0xff] }
  0x20   : > { %942 = vmatprep.subr.msk.bf16.mxu0 %vm1216_vm1, %v940_v12  ;;  %v970_v39 = vpack.c.bf16 %v254_v38, %v253_v37  ;;  %v256_v41 = vld [vmem:[%s1212_s15 + $0x78] sm:$0xff]  ;;  %s1389_s15 = scalar_lea.hbm %s1436_s5, %s1198_s6 }
  0x21   : > { %315 = vperm.xlu0 %1049, %v265_v20   ;;  %v976_v42 = vpack.c.bf16 %v256_v41, %v255_v40 }
  0x22   : > { %320 = vperm.xlu1 %1050, %v266_v21  }
  0x25   : > { %325 = vperm.xlu0 %1049, %v267_v24  }
  0x26   : > { %330 = vperm.xlu1 %1050, %v268_v26  }
  0x27   : > { %945 = vmatpush3.bf16.xpose.msk.msra.mxu0 %vm1216_vm1, %v940_v12 }
  0x28   : > { %948 = vmatprep.subr.msk.bf16.mxu0 %vm1216_vm1, %v946_v18 }
  0x29   : > { %335 = vperm.xlu0 %1049, %v269_v27  }
  0x2a   : > { %340 = vperm.xlu1 %1050, %v270_v28  }
  0x2d   : > { %345 = vperm.xlu0 %1049, %v271_v31  }
  0x2e   : > { %350 = vperm.xlu1 %1050, %v272_v33  }
  0x2f   : > { %951 = vmatpush3.bf16.xpose.msk.msra.mxu0 %vm1216_vm1, %v946_v18 }
  0x30   : > { %954 = vmatprep.subr.msk.bf16.mxu0 %vm1216_vm1, %v952_v25 }
  0x37   : > { %957 = vmatpush3.bf16.xpose.msk.msra.mxu0 %vm1216_vm1, %v952_v25 }
  0x38   : > { %960 = vmatprep.subr.msk.bf16.mxu0 %vm1216_vm1, %v958_v32 }
  0x3f   : > { %963 = vmatpush3.bf16.xpose.msk.msra.mxu0 %vm1216_vm1, %v958_v32 }
  0x40   : > { %966 = vmatprep.subr.msk.bf16.mxu0 %vm1216_vm1, %v964_v36 }
  0x47   : > { %969 = vmatpush3.bf16.xpose.msk.msra.mxu0 %vm1216_vm1, %v964_v36 }
  0x48   : > { %972 = vmatprep.subr.msk.bf16.mxu0 %vm1216_vm1, %v970_v39 }
  0x4f   : > { %975 = vmatpush3.bf16.xpose.msk.msra.mxu0 %vm1216_vm1, %v970_v39 }
  0x50   : > { %978 = vmatprep.subr.msk.bf16.mxu0 %vm1216_vm1, %v976_v42 }
  0x57   : > { %981 = vmatpush3.bf16.xpose.msk.msra.mxu0 %vm1216_vm1, %v976_v42 }
  0x5e   : > { %876 = vmatmul.mubr.msk.f32.vlgmr.msra.gmra.mrb[0].mxu0 %vm353_vm0, %v226_v43 }
  0x5f   : > { %878 = vmatprep.mubr.msk.f32.mxu0 %vm353_vm0, %v227_v44 }
  0x62   : > { %879 = vmatmul.mubr.msk.f32.gmra.mrb[2].mxu0 %vm353_vm0, %v228_v45 }
  0x63   : > { %881 = vmatprep.mubr.msk.f32.mxu0 %vm353_vm0, %v229_v46 }
  0x66   : > { %882 = vmatmul.mubr.msk.f32.gmra.mrb[4].mxu0 %vm353_vm0, %v230_v47 }
  0x67   : > { %884 = vmatprep.mubr.msk.f32.mxu0 %vm353_vm0, %v231_v48 }
  0x6a   : > { %885 = vmatmul.mubr.msk.f32.gmra.mrb[6].mxu0 %vm353_vm0, %v232_v49 }
  0x6b   : > { %887 = vmatprep.mubr.msk.f32.mxu0 %vm353_vm0, %v233_v50 }
  0x6e   : > { %888 = vmatmul.mubr.msk.f32.gmra.mrb[8].mxu0 %vm353_vm0, %v234_v51 }
  0x6f   : > { %890 = vmatprep.mubr.msk.f32.mxu0 %vm353_vm0, %v235_v52 }
  0x72   : > { %891 = vmatmul.mubr.msk.f32.gmra.mrb[10].mxu0 %vm353_vm0, %v236_v53 }
  0x73   : > { %893 = vmatprep.mubr.msk.f32.mxu0 %vm353_vm0, %v237_v54 }
  0x76   : > { %894 = vmatmul.mubr.msk.f32.gmra.mrb[12].mxu0 %vm353_vm0, %v238_v55 }
  0x77   : > { %896 = vmatprep.mubr.msk.f32.mxu0 %vm353_vm0, %v239_v56 }
  0x7a   : > { %897 = vmatmul.mubr.msk.f32.gmra.mrb[14].mxu0 %vm353_vm0, %v240_v57 }
  0x90   : > { %v276_v61 = vpop.permute.xlu0 %275 }
  0x91   : > { %v286_v60 = vpop.permute.xlu1 %285 }
  0x94   : > { %v281_v63 = vpop.permute.xlu0 %280 }
  0x95   : > { %v291_v62 = vpop.permute.xlu1 %290 }
  0x98   : > { %v296_v1 = vpop.permute.xlu0 %295 }
  0x99   : > { %v301_v0 = vpop.permute.xlu1 %300 }
  0x9c   : > { %v306_v10 = vpop.permute.xlu0 %305 }
  0x9d   : > { %v311_v7 = vpop.permute.xlu1 %310 }
  0xa0   : > { %v316_v23 = vpop.permute.xlu0 %315 }
  0xa1   : > { %v321_v20 = vpop.permute.xlu1 %320 }
  0xa4   : > { %v326_v35 = vpop.permute.xlu0 %325 }
  0xa5   : > { %v331_v32 = vpop.permute.xlu1 %330 }
  0xa8   : > { %v336_v48 = vpop.permute.xlu0 %335 }
  0xa9   : > { %v341_v45 = vpop.permute.xlu1 %340 }
  0xad   : > { %v351_v57 = vpop.permute.xlu1 %350 }
 0x131   : > { %v877_v2 = vpop.f32.mrb[0].mxu0 }
 0x132   : > { %v522_v3 = vadd.f32 %v877_v2, %v281_v63  ;;  %v516_v4 = vpop.f32.mrb[1].mxu0 }
 0x133   : > { %v517_v5 = vadd.f32 %v516_v4, %v276_v61  ;;  %v346_v61 = vpop.permute.xlu0 %345 }
 0x134   : > { %v596_v6 = vmax.f32 %v522_v3, 0.0 }
 0x135   : > { %v595_v8 = vmax.f32 %v517_v5, 0.0  ;;  %v880_v9 = vpop.f32.mrb[2].mxu0  ;;  %v611_v5 = vld [vmem:[%s1434_s3] sm:$0x1] }
 0x136   : > { %v532_v11 = vadd.f32 %v880_v9, %v291_v62  ;;  %v526_v12 = vpop.f32.mrb[3].mxu0 }
 0x137   : > { %v527_v13 = vadd.f32 %v526_v12, %v286_v60  ;;  %v983_v14 = vpack.c.bf16 %v596_v6, %v595_v8  ;;  %v613_v6 = vstv %s612_s11 }
 0x138   : > { %v598_v15 = vmax.f32 %v532_v11, 0.0 }
 0x139   : > { %v597_v16 = vmax.f32 %v527_v13, 0.0  ;;  %v883_v17 = vpop.f32.mrb[4].mxu0  ;;  %984 = vmatpush3.bf16.msra.mxu1 %v983_v14 }
 0x13a   : > { %v542_v18 = vadd.f32 %v883_v17, %v301_v0  ;;  %v536_v19 = vpop.f32.mrb[5].mxu0  ;;  %985 = vmatprep.subr.bf16.mxu1 %v1116_v58 }
 0x13b   : > { %v986_v21 = vpack.c.bf16 %v598_v15, %v597_v16  ;;  %v537_v22 = vadd.f32 %v536_v19, %v296_v1 }
 0x13c   : > { %v600_v24 = vmax.f32 %v542_v18, 0.0 }
 0x13d   : > { %v599_v25 = vmax.f32 %v537_v22, 0.0  ;;  %v886_v26 = vpop.f32.mrb[6].mxu0  ;;  %987 = vmatpush3.bf16.msra.mxu1 %v986_v21 }
 0x13e   : > { %v552_v27 = vadd.f32 %v886_v26, %v311_v7  ;;  %v546_v28 = vpop.f32.mrb[7].mxu0  ;;  %988 = vmatprep.subr.bf16.mxu1 %v1116_v58 }
 0x13f   : > { %v989_v29 = vpack.c.bf16 %v600_v24, %v599_v25  ;;  %v547_v30 = vadd.f32 %v546_v28, %v306_v10 }
 0x140   : > { %v602_v31 = vmax.f32 %v552_v27, 0.0 }
 0x141   : > { %v601_v33 = vmax.f32 %v547_v30, 0.0  ;;  %v889_v34 = vpop.f32.mrb[8].mxu0  ;;  %990 = vmatpush3.bf16.msra.mxu1 %v989_v29 }
 0x142   : > { %v562_v36 = vadd.f32 %v889_v34, %v321_v20  ;;  %v556_v37 = vpop.f32.mrb[9].mxu0  ;;  %991 = vmatprep.subr.bf16.mxu1 %v1116_v58 }
 0x143   : > { %v992_v38 = vpack.c.bf16 %v602_v31, %v601_v33  ;;  %v557_v39 = vadd.f32 %v556_v37, %v316_v23 }
 0x144   : > { %v604_v40 = vmax.f32 %v562_v36, 0.0 }
 0x145   : > { %v603_v41 = vmax.f32 %v557_v39, 0.0  ;;  %v892_v42 = vpop.f32.mrb[10].mxu0  ;;  %993 = vmatpush3.bf16.msra.mxu1 %v992_v38 }
 0x146   : > { %v572_v43 = vadd.f32 %v892_v42, %v331_v32  ;;  %v566_v44 = vpop.f32.mrb[11].mxu0  ;;  %994 = vmatprep.subr.bf16.mxu1 %v1116_v58 }
 0x147   : > { %v995_v46 = vpack.c.bf16 %v604_v40, %v603_v41  ;;  %v567_v47 = vadd.f32 %v566_v44, %v326_v35 }
 0x148   : > { %v606_v49 = vmax.f32 %v572_v43, 0.0 }
 0x149   : > { %v605_v50 = vmax.f32 %v567_v47, 0.0  ;;  %v895_v51 = vpop.f32.mrb[12].mxu0  ;;  %996 = vmatpush3.bf16.msra.mxu1 %v995_v46 }
 0x14a   : > { %v582_v52 = vadd.f32 %v895_v51, %v341_v45  ;;  %v576_v53 = vpop.f32.mrb[13].mxu0  ;;  %997 = vmatprep.subr.bf16.mxu1 %v1116_v58 }
 0x14b   : > { %v998_v54 = vpack.c.bf16 %v606_v49, %v605_v50  ;;  %v577_v55 = vadd.f32 %v576_v53, %v336_v48 }
 0x14c   : > { %v608_v56 = vmax.f32 %v582_v52, 0.0 }
 0x14d   : > { %v607_v59 = vmax.f32 %v577_v55, 0.0  ;;  %v898_v60 = vpop.f32.mrb[14].mxu0  ;;  %999 = vmatpush3.bf16.msra.mxu1 %v998_v54 }
 0x14e   : > { %v592_v62 = vadd.f32 %v898_v60, %v351_v57  ;;  %v586_v63 = vpop.f32.mrb[15].mxu0  ;;  %1000 = vmatprep.subr.bf16.mxu1 %v1116_v58 }
 0x14f   : > { %v1001_v0 = vpack.c.bf16 %v608_v56, %v607_v59  ;;  %v587_v1 = vadd.f32 %v586_v63, %v346_v61 }
 0x150   : > { %v610_v2 = vmax.f32 %v592_v62, 0.0 }
 0x151   : > { %v609_v3 = vmax.f32 %v587_v1, 0.0  ;;  %1002 = vmatpush3.bf16.msra.mxu1 %v1001_v0 }
 0x152   : > { %1003 = vmatprep.subr.bf16.mxu1 %v1116_v58 }
 0x153   : > { %v1004_v4 = vpack.c.bf16 %v610_v2, %v609_v3 }
 0x155   : > { %1005 = vmatpush3.bf16.msra.mxu1 %v1004_v4 }
 0x158   : > { %932 = vmatmul.mubr.f32.vlgmr.msra.gmra.mrb[0].mxu1 %v611_v5 }
 0x22b   : > { %v680_v7 = vpop.f32.mrb[0].mxu1 }
 0x22c   : > { %v681_v8 = vadd.f32 %v680_v7, %v613_v6  ;;  %v933_v9 = vpop.f32.mrb[1].mxu1 }
 0x22e   : > { %684 = vst [vmem:[%s218_s13] sm:$0x1] %v681_v8 }
 0x22f   : > { %1064 = shalt.err (!%p1061_p3)
}
 0x230   : > { %s1065_s6 = scalar_lea.hbm %s1389_s15, 16  ;;  %s1069_s8 = scalar_lea.hbm %s1436_s5, 48 }
 0x231   : > { %p1066_p4 = scmp.ne.s32.totalorder %s1389_s15, %s1065_s6  ;;  %p1070_p9 = scmp.lt.u32.totalorder %s1389_s15, %s1436_s5 }
 0x232   : > { %p1071_p10 = scmp.lt.u32.totalorder %s1069_s8, %s1065_s6  ;;  %p1073_p12 = scmp.lt.u32.totalorder %s1065_s6, %s1389_s15 }
 0x233   : > { %p1067_p7 = pnand %p1066_p4, %p1188_p5 }
 0x234   : > { %p1072_p11 = por %p1071_p10, %p1070_p9 }
 0x235   : > { %p1068_p8 = pneg %p1067_p7 }
 0x236   : > { %p1074_p13 = por %p1073_p12, %p1072_p11 }
 0x238   : > { %p1075_p0 = pnand %p1074_p13, %p1068_p8 }
 0x23a   : > { %1078 = shalt.err (!%p1075_p0)
}
 0x23b   : > { %1006 = dma.vmem_to_hbm [thread:$0]  (%p1188_p5), %s1391_s14, 16, %s1389_s15, %s686_s18  }
 0x23c PF: > { %p1012_p1 = scmp.ge.s32.totalorder %s1113_s23, 2  ;;  %s710_s11 = sand.u32 1, %s1101_s20  }
 0x23d   : > { %s711_s12 = scalar_lea.sflag [#allocation4], %s710_s11 }
 0x23e   : > { %p1009_p2 = pnand %p1012_p1, %p1192_p6 }
 0x240   : > { %1096 = dma.done.wait (!%p1009_p2), %s711_s12, 16  }
 0x241   : > { %1098 = vsyncadd (!%p1009_p2), %s711_s12, 4294967280  ;;  %p16_p3 = scmp.ge.s32.totalorder %s1176_s25, 5   ;;  %s1441_s20 = smov %s1105_s21 }
 0x242   : > { %s1442_s21 = smov %s1109_s22  ;;  %s1443_s22 = smov %s1186_s28 }
 0x243   : > { %s1444_s23 = smov %s1176_s25  ;;  %18 = sbr.rel (!%p16_p3) target bundleno = 5 (0x5), region = 75 }
 0x24a   :  { %715 = vsyncpa [#allocation4], 1 }
 0x24b   :  { %717 = vsyncpa [#allocation4 + $0x1], 1 }

</bundles_post_ra>
